<compile_context>
chip_gen: v7x
topology: tpu7x:2x2x1
jax: 0.10.0
libtpu: 0.0.40
codegen_flags: <defaults>
</compile_context>

<pallas_src>
import functools
from collections import OrderedDict

import numpy as np

import jax
import jax.numpy as jnp
from jax.experimental import pallas as pl
from jax.experimental.pallas import tpu as pltpu

_LANES = 128
_SUBLANES = 8
_MAX_KEYS = 127                           # K key lanes + 1 total lane <= 128
_VMEM_BUDGET_BYTES = 12 * 1024 * 1024     # stays well under v7x 32 MiB scoped VMEM


# --------------------------------------------------------------------------
# Fused kernel: all loss tensors -> (per-key means, weighted total) in 1 launch
# --------------------------------------------------------------------------
def _fused_losses_kernel(*refs, inv_counts, key_terms, loss_flags):
    """refs = (*loss_tensor_refs, out_ref); each tensor is a full VMEM block.

    For each tensor: exactly one full reduce (f32 accumulation) scaled by the
    true 1/n (wrapper zero padding, if any, cancels exactly).  Per-key values
    mirror the torch reference (sum of means for list entries).  Output is a
    lane-dense (1, 128) vector:
        lane k (k < num_keys) -> log value of key k
        lane num_keys         -> weighted total (keys containing 'loss')
        remaining lanes       -> 0
    """
    out_ref = refs[-1]
    x_refs = refs[:-1]

    # One reduce per tensor (not per tile); accumulate in f32 on every chip gen.
    term_means = [
        jnp.sum(x[...].astype(jnp.float32)) * inv
        for x, inv in zip(x_refs, inv_counts)
    ]

    # Per-key log values: list-valued keys are the sum of their members' means.
    key_vals = [
        sum((term_means[t] for t in terms), jnp.float32(0.0))
        for terms in key_terms
    ]

    # Weighted total loss: sum of values whose key contains 'loss'.
    total = sum((v for v, f in zip(key_vals, loss_flags) if f),
                jnp.float32(0.0))

    lane = jax.lax.broadcasted_iota(jnp.int32, (1, _LANES), 1)
    out = jnp.zeros((1, _LANES), jnp.float32)
    for k, v in enumerate(key_vals):
        out = jnp.where(lane == k, v, out)
    out = jnp.where(lane == len(key_vals), total, out)
    out_ref[...] = out


# --------------------------------------------------------------------------
# Wrapper plumbing: layout planning + cached jitted call per dict signature
# --------------------------------------------------------------------------
def _plan_2d(shape, dtype_str):
    """Return ((rows, cols), tail_pad, true_count, kept_dtype) for one tensor."""
    n = 1
    for d in shape:
        n *= int(d)
    kept = jnp.bfloat16 if dtype_str == "bfloat16" else jnp.float32
    if n % _LANES == 0 and n > 0:
        return (n // _LANES, _LANES), 0, n, kept            # free bitcast reshape
    if n <= _SUBLANES * _LANES:
        return (1, n), 0, n, kept                           # tiny ragged tensor
    # Large ragged tensor: pad only the flat tail to a lane multiple (<=127 elems).
    # TODO(synk): in-kernel tail masking would avoid even this small copy.
    pad = (-n) % _LANES
    return ((n + pad) // _LANES, _LANES), pad, n, kept


@functools.lru_cache(maxsize=None)
def _build_parse_fn(shapes, dtype_strs, key_terms, loss_flags):
    """Build (and cache) one jitted fused-loss-parse callable per signature."""
    plans = [_plan_2d(s, d) for s, d in zip(shapes, dtype_strs)]
    shapes2d = tuple(p[0] for p in plans)
    inv_counts = tuple(1.0 / float(p[2]) for p in plans)

    # VMEM footprint sanity check (full-array blocks, rounded to (8,128) tiles).
    vmem = 0
    for (r, c), _pad, _n, dt in plans:
        esize = 2 if dt == jnp.bfloat16 else 4
        vmem += (-(-r // _SUBLANES) * _SUBLANES) * (-(-c // _LANES) * _LANES) * esize
    # TODO(synk): loss tensors too large for one fused VMEM-resident launch would
    # need a chunked-grid reduction (512+-row blocks, vreg accumulation, optional
    # 2-TensorCore split on v7x); loss dicts never reach that size in practice.
    assert vmem <= _VMEM_BUDGET_BYTES, (
        f"fused loss buffer ({vmem} bytes) exceeds the VMEM budget")

    kernel = functools.partial(
        _fused_losses_kernel,
        inv_counts=inv_counts,
        key_terms=key_terms,
        loss_flags=loss_flags,
    )

    call = pl.pallas_call(
        kernel,
        out_shape=jax.ShapeDtypeStruct((1, _LANES), jnp.float32),
        grid=(1,),  # single step: every tensor is one whole-array block
        in_specs=[pl.BlockSpec(s2d, lambda i: (0, 0)) for s2d in shapes2d],
        out_specs=pl.BlockSpec((1, _LANES), lambda i: (0, 0)),
        compiler_params=pltpu.CompilerParams(
            dimension_semantics=("arbitrary",)),
    )

    def parse(*tensors):
        xs = []
        for t, ((rows, cols), pad, _n, dt) in zip(tensors, plans):
            t = t.astype(dt)
            flat = t.reshape(-1)
            if pad:
                flat = jnp.pad(flat, (0, pad))      # tiny tail only, zeros cancel
            xs.append(flat.reshape(rows, cols))
        return call(*xs)

    return jax.jit(parse)


# --------------------------------------------------------------------------
# Module
# --------------------------------------------------------------------------
class BaseFusionModel:
    """JAX/Pallas port of the abstract BaseFusionModel."""

    def __init__(self):
        self.fp16_enabled = False  # no learnable parameters in the base class

    # ---- dispatch (mirrors torch forward) --------------------------------
    def __call__(self, *args, **kwargs):
        return self.forward(*args, **kwargs)

    def forward(self, return_loss=True, **kwargs):
        if return_loss:
            return self.forward_train(**kwargs)
        return self.forward_test(**kwargs)

    def forward_train(self, **kwargs):
        raise NotImplementedError  # abstract in the reference module

    def forward_test(self, **kwargs):
        return self.simple_test(**kwargs)

    def simple_test(self, **kwargs):
        raise NotImplementedError  # abstract in the reference module

    # ---- loss parsing (the actual compute, one fused kernel launch) ------
    def _parse_losses(self, losses):
        keys = list(losses.keys())
        assert len(keys) <= _MAX_KEYS, "too many loss entries for one launch"

        tensors = []
        key_terms = []
        for name in keys:
            value = losses[name]
            if isinstance(value, (list, tuple)):
                ids = tuple(range(len(tensors), len(tensors) + len(value)))
                tensors.extend(jnp.asarray(v) for v in value)
                key_terms.append(ids)
            elif isinstance(value, jax.Array) or hasattr(value, "shape"):
                key_terms.append((len(tensors),))
                tensors.append(jnp.asarray(value))
            else:
                raise TypeError(
                    f"{name} is not a tensor or list of tensors")

        if not tensors:  # degenerate dict (e.g. only empty lists)
            loss = jnp.zeros((), jnp.float32)
            log_vars = OrderedDict((k, 0.0) for k in keys)
            log_vars["loss"] = 0.0
            return loss, log_vars

        parse_fn = _build_parse_fn(
            tuple(tuple(int(d) for d in t.shape) for t in tensors),
            tuple(str(t.dtype) for t in tensors),
            tuple(key_terms),
            tuple("loss" in name for name in keys),
        )
        out_vec = parse_fn(*tensors)                  # (1, 128) on device
        num_keys = len(keys)
        loss = out_vec[0, num_keys]                   # device scalar (stays on TPU)

        # ONE device->host transfer for all log values.
        host = np.asarray(jax.device_get(out_vec))
        log_vars = OrderedDict(
            (name, float(host[0, i])) for i, name in enumerate(keys))
        log_vars["loss"] = float(host[0, num_keys])
        # TODO(synk): torch.distributed all_reduce averaging skipped (single process).
        return loss, log_vars

    def train_step(self, data, optimizer=None):
        losses = self(**data)
        loss, log_vars = self._parse_losses(losses)
        outputs = dict(loss=loss, log_vars=log_vars,
                       num_samples=len(data["gt_labels"]))
        return outputs


class _DemoFusionModel(BaseFusionModel):
    """Minimal concrete subclass: forward_train just emits the loss dict."""

    def forward_train(self, losses=None, gt_labels=None, **kwargs):
        return losses


# --------------------------------------------------------------------------
# Self-test
# --------------------------------------------------------------------------
if __name__ == "__main__":
    key = jax.random.PRNGKey(0)
    k1, k2, k3, k4, k5, k6 = jax.random.split(key, 6)

    # Synthetic raw network outputs (what a concrete forward_train would emit).
    losses = {
        "loss_cls": jnp.abs(jax.random.normal(k1, (2, 4, 16, 16), jnp.float32)),
        "loss_bbox": [
            jnp.abs(jax.random.normal(k2, (2, 16, 4), jnp.float32)),
            jnp.abs(jax.random.normal(k3, (2, 16, 4), jnp.float32)),
        ],
        "loss_seg": jnp.abs(jax.random.normal(k4, (2, 8, 32, 32), jnp.float32)),
        "loss_aux": jnp.abs(jax.random.normal(k5, (5, 300), jnp.float32)),
        "acc": jax.random.uniform(k6, (2,), jnp.float32),  # logged, not summed
    }
    data = dict(losses=losses, gt_labels=[jnp.zeros((3,)), jnp.zeros((5,))])

    model = _DemoFusionModel()
    outputs = model.train_step(data, optimizer=None)
    loss = jax.block_until_ready(outputs["loss"])

    # Reference check against plain-JAX semantics of _parse_losses.
    ref_vals = {
        "loss_cls": float(jnp.mean(losses["loss_cls"])),
        "loss_bbox": float(jnp.mean(losses["loss_bbox"][0])
                           + jnp.mean(losses["loss_bbox"][1])),
        "loss_seg": float(jnp.mean(losses["loss_seg"])),
        "loss_aux": float(jnp.mean(losses["loss_aux"])),
        "acc": float(jnp.mean(losses["acc"])),
    }
    ref_loss = (ref_vals["loss_cls"] + ref_vals["loss_bbox"]
                + ref_vals["loss_seg"] + ref_vals["loss_aux"])

    tol = 1e-4 * max(1.0, abs(ref_loss))
    assert abs(float(loss) - ref_loss) < tol, (float(loss), ref_loss)
    assert abs(outputs["log_vars"]["loss"] - ref_loss) < tol
    for name, ref_v in ref_vals.items():
        assert abs(outputs["log_vars"][name] - ref_v) < 1e-4 * max(1.0, abs(ref_v)), name
    assert outputs["num_samples"] == 2
    assert "acc" in outputs["log_vars"] and "loss" in outputs["log_vars"]

    print("KERNEL_OK")
</pallas_src>

<mosaic_0001>
module attributes {stable_mosaic.version = 11 : i64} {
  func.func @_fused_losses_kernel(%arg0: i32, %arg1: memref<16x128xf32, #tpu.memory_space<vmem>>, %arg2: memref<1x128xf32, #tpu.memory_space<vmem>>, %arg3: memref<1x128xf32, #tpu.memory_space<vmem>>, %arg4: memref<128x128xf32, #tpu.memory_space<vmem>>, %arg5: memref<12x128xf32, #tpu.memory_space<vmem>>, %arg6: memref<1x2xf32, #tpu.memory_space<vmem>>, %arg7: memref<1x128xf32, #tpu.memory_space<vmem>>) attributes {dimension_semantics = [#tpu.dimension_semantics<arbitrary>], iteration_bounds = array<i64: 1>, scalar_prefetch = 0 : i64, scratch_operands = 0 : i64, tpu.core_type = #tpu.core_type<tc>, window_params = [{pipeline_mode = #tpu.pipeline_mode<synchronous>, transform_indices = @transform_0, window_bounds = array<i64: 16, 128>}, {pipeline_mode = #tpu.pipeline_mode<synchronous>, transform_indices = @transform_1, window_bounds = array<i64: 1, 128>}, {pipeline_mode = #tpu.pipeline_mode<synchronous>, transform_indices = @transform_2, window_bounds = array<i64: 1, 128>}, {pipeline_mode = #tpu.pipeline_mode<synchronous>, transform_indices = @transform_3, window_bounds = array<i64: 128, 128>}, {pipeline_mode = #tpu.pipeline_mode<synchronous>, transform_indices = @transform_4, window_bounds = array<i64: 12, 128>}, {pipeline_mode = #tpu.pipeline_mode<synchronous>, transform_indices = @transform_5, window_bounds = array<i64: 1, 2>}, {pipeline_mode = #tpu.pipeline_mode<synchronous>, transform_indices = @transform_6, window_bounds = array<i64: 1, 128>}]} {
    %c0 = arith.constant 0 : index
    %c0_0 = arith.constant 0 : index
    %0 = vector.load %arg1[%c0, %c0_0] : memref<16x128xf32, #tpu.memory_space<vmem>>, vector<16x128xf32>
    %1 = vector.shape_cast %0 : vector<16x128xf32> to vector<1x16x128xf32>
    %cst = arith.constant dense<0.000000e+00> : vector<1xf32>
    %2 = vector.multi_reduction <add>, %1, %cst [1, 2] : vector<1x16x128xf32> to vector<1xf32>
    %3 = vector.shape_cast %2 : vector<1xf32> to vector<1x1x1xf32>
    %4 = vector.extract %3[0, 0, 0] : f32 from vector<1x1x1xf32>
    %cst_1 = arith.constant 4.8828125E-4 : f32
    %5 = arith.mulf %4, %cst_1 : f32
    %c0_2 = arith.constant 0 : index
    %c0_3 = arith.constant 0 : index
    %6 = vector.load %arg2[%c0_2, %c0_3] : memref<1x128xf32, #tpu.memory_space<vmem>>, vector<1x128xf32>
    %7 = vector.shape_cast %6 : vector<1x128xf32> to vector<1x1x128xf32>
    %cst_4 = arith.constant dense<0.000000e+00> : vector<1xf32>
    %8 = vector.multi_reduction <add>, %7, %cst_4 [1, 2] : vector<1x1x128xf32> to vector<1xf32>
    %9 = vector.shape_cast %8 : vector<1xf32> to vector<1x1x1xf32>
    %10 = vector.extract %9[0, 0, 0] : f32 from vector<1x1x1xf32>
    %cst_5 = arith.constant 7.812500e-03 : f32
    %11 = arith.mulf %10, %cst_5 : f32
    %c0_6 = arith.constant 0 : index
    %c0_7 = arith.constant 0 : index
    %12 = vector.load %arg3[%c0_6, %c0_7] : memref<1x128xf32, #tpu.memory_space<vmem>>, vector<1x128xf32>
    %13 = vector.shape_cast %12 : vector<1x128xf32> to vector<1x1x128xf32>
    %cst_8 = arith.constant dense<0.000000e+00> : vector<1xf32>
    %14 = vector.multi_reduction <add>, %13, %cst_8 [1, 2] : vector<1x1x128xf32> to vector<1xf32>
    %15 = vector.shape_cast %14 : vector<1xf32> to vector<1x1x1xf32>
    %16 = vector.extract %15[0, 0, 0] : f32 from vector<1x1x1xf32>
    %cst_9 = arith.constant 7.812500e-03 : f32
    %17 = arith.mulf %16, %cst_9 : f32
    %c0_10 = arith.constant 0 : index
    %c0_11 = arith.constant 0 : index
    %18 = vector.load %arg4[%c0_10, %c0_11] : memref<128x128xf32, #tpu.memory_space<vmem>>, vector<128x128xf32>
    %19 = vector.shape_cast %18 : vector<128x128xf32> to vector<1x128x128xf32>
    %cst_12 = arith.constant dense<0.000000e+00> : vector<1xf32>
    %20 = vector.multi_reduction <add>, %19, %cst_12 [1, 2] : vector<1x128x128xf32> to vector<1xf32>
    %21 = vector.shape_cast %20 : vector<1xf32> to vector<1x1x1xf32>
    %22 = vector.extract %21[0, 0, 0] : f32 from vector<1x1x1xf32>
    %cst_13 = arith.constant 6.10351563E-5 : f32
    %23 = arith.mulf %22, %cst_13 : f32
    %c0_14 = arith.constant 0 : index
    %c0_15 = arith.constant 0 : index
    %24 = vector.load %arg5[%c0_14, %c0_15] : memref<12x128xf32, #tpu.memory_space<vmem>>, vector<12x128xf32>
    %25 = vector.shape_cast %24 : vector<12x128xf32> to vector<1x12x128xf32>
    %cst_16 = arith.constant dense<0.000000e+00> : vector<1xf32>
    %26 = vector.multi_reduction <add>, %25, %cst_16 [1, 2] : vector<1x12x128xf32> to vector<1xf32>
    %27 = vector.shape_cast %26 : vector<1xf32> to vector<1x1x1xf32>
    %28 = vector.extract %27[0, 0, 0] : f32 from vector<1x1x1xf32>
    %cst_17 = arith.constant 6.66666659E-4 : f32
    %29 = arith.mulf %28, %cst_17 : f32
    %c0_18 = arith.constant 0 : index
    %c0_19 = arith.constant 0 : index
    %30 = vector.load %arg6[%c0_18, %c0_19] : memref<1x2xf32, #tpu.memory_space<vmem>>, vector<1x2xf32>
    %31 = vector.shape_cast %30 : vector<1x2xf32> to vector<1x1x2xf32>
    %cst_20 = arith.constant dense<0.000000e+00> : vector<1xf32>
    %32 = vector.multi_reduction <add>, %31, %cst_20 [1, 2] : vector<1x1x2xf32> to vector<1xf32>
    %33 = vector.shape_cast %32 : vector<1xf32> to vector<1x1x1xf32>
    %34 = vector.extract %33[0, 0, 0] : f32 from vector<1x1x1xf32>
    %cst_21 = arith.constant 5.000000e-01 : f32
    %35 = arith.mulf %34, %cst_21 : f32
    %cst_22 = arith.constant 0.000000e+00 : f32
    %36 = arith.addf %cst_22, %5 : f32
    %cst_23 = arith.constant 0.000000e+00 : f32
    %37 = arith.addf %cst_23, %11 : f32
    %38 = arith.addf %37, %17 : f32
    %cst_24 = arith.constant 0.000000e+00 : f32
    %39 = arith.addf %cst_24, %23 : f32
    %cst_25 = arith.constant 0.000000e+00 : f32
    %40 = arith.addf %cst_25, %29 : f32
    %cst_26 = arith.constant 0.000000e+00 : f32
    %41 = arith.addf %cst_26, %35 : f32
    %cst_27 = arith.constant 0.000000e+00 : f32
    %42 = arith.addf %cst_27, %36 : f32
    %43 = arith.addf %42, %38 : f32
    %44 = arith.addf %43, %39 : f32
    %45 = arith.addf %44, %40 : f32
    %46 = tpu.iota {dimensions = array<i32: 1>} : vector<1x128xi32>
    %cst_28 = arith.constant 0.000000e+00 : f32
    %47 = vector.broadcast %cst_28 : f32 to vector<1x128xf32>
    %c0_i32 = arith.constant 0 : i32
    %48 = vector.broadcast %c0_i32 : i32 to vector<1x128xi32>
    %49 = arith.cmpi eq, %46, %48 : vector<1x128xi32>
    %50 = vector.broadcast %36 : f32 to vector<1x128xf32>
    %51 = arith.select %49, %50, %47 : vector<1x128xi1>, vector<1x128xf32>
    %c1_i32 = arith.constant 1 : i32
    %52 = vector.broadcast %c1_i32 : i32 to vector<1x128xi32>
    %53 = arith.cmpi eq, %46, %52 : vector<1x128xi32>
    %54 = vector.broadcast %38 : f32 to vector<1x128xf32>
    %55 = arith.select %53, %54, %51 : vector<1x128xi1>, vector<1x128xf32>
    %c2_i32 = arith.constant 2 : i32
    %56 = vector.broadcast %c2_i32 : i32 to vector<1x128xi32>
    %57 = arith.cmpi eq, %46, %56 : vector<1x128xi32>
    %58 = vector.broadcast %39 : f32 to vector<1x128xf32>
    %59 = arith.select %57, %58, %55 : vector<1x128xi1>, vector<1x128xf32>
    %c3_i32 = arith.constant 3 : i32
    %60 = vector.broadcast %c3_i32 : i32 to vector<1x128xi32>
    %61 = arith.cmpi eq, %46, %60 : vector<1x128xi32>
    %62 = vector.broadcast %40 : f32 to vector<1x128xf32>
    %63 = arith.select %61, %62, %59 : vector<1x128xi1>, vector<1x128xf32>
    %c4_i32 = arith.constant 4 : i32
    %64 = vector.broadcast %c4_i32 : i32 to vector<1x128xi32>
    %65 = arith.cmpi eq, %46, %64 : vector<1x128xi32>
    %66 = vector.broadcast %41 : f32 to vector<1x128xf32>
    %67 = arith.select %65, %66, %63 : vector<1x128xi1>, vector<1x128xf32>
    %c5_i32 = arith.constant 5 : i32
    %68 = vector.broadcast %c5_i32 : i32 to vector<1x128xi32>
    %69 = arith.cmpi eq, %46, %68 : vector<1x128xi32>
    %70 = vector.broadcast %45 : f32 to vector<1x128xf32>
    %71 = arith.select %69, %70, %67 : vector<1x128xi1>, vector<1x128xf32>
    %c0_29 = arith.constant 0 : index
    %c0_30 = arith.constant 0 : index
    %72 = vector.load %arg7[%c0_29, %c0_30] : memref<1x128xf32, #tpu.memory_space<vmem>>, vector<1x128xf32>
    tpu.vector_store %arg7[%c0_29, %c0_30], %71 {strides = array<i32>} : memref<1x128xf32, #tpu.memory_space<vmem>>, vector<1x128xf32>,
    return
  }
  func.func @transform_0(%arg0: i32) -> (i32, i32) {
    %c0_i32 = arith.constant 0 : i32
    %c0_i32_0 = arith.constant 0 : i32
    %c0_i32_1 = arith.constant 0 : i32
    return %c0_i32, %c0_i32_0 : i32, i32
  }
  func.func @transform_1(%arg0: i32) -> (i32, i32) {
    %c0_i32 = arith.constant 0 : i32
    %c0_i32_0 = arith.constant 0 : i32
    %c0_i32_1 = arith.constant 0 : i32
    return %c0_i32, %c0_i32_0 : i32, i32
  }
  func.func @transform_2(%arg0: i32) -> (i32, i32) {
    %c0_i32 = arith.constant 0 : i32
    %c0_i32_0 = arith.constant 0 : i32
    %c0_i32_1 = arith.constant 0 : i32
    return %c0_i32, %c0_i32_0 : i32, i32
  }
  func.func @transform_3(%arg0: i32) -> (i32, i32) {
    %c0_i32 = arith.constant 0 : i32
    %c0_i32_0 = arith.constant 0 : i32
    %c0_i32_1 = arith.constant 0 : i32
    return %c0_i32, %c0_i32_0 : i32, i32
  }
  func.func @transform_4(%arg0: i32) -> (i32, i32) {
    %c0_i32 = arith.constant 0 : i32
    %c0_i32_0 = arith.constant 0 : i32
    %c0_i32_1 = arith.constant 0 : i32
    return %c0_i32, %c0_i32_0 : i32, i32
  }
  func.func @transform_5(%arg0: i32) -> (i32, i32) {
    %c0_i32 = arith.constant 0 : i32
    %c0_i32_0 = arith.constant 0 : i32
    %c0_i32_1 = arith.constant 0 : i32
    return %c0_i32, %c0_i32_0 : i32, i32
  }
  func.func @transform_6(%arg0: i32) -> (i32, i32) {
    %c0_i32 = arith.constant 0 : i32
    %c0_i32_0 = arith.constant 0 : i32
    %c0_i32_1 = arith.constant 0 : i32
    return %c0_i32, %c0_i32_0 : i32, i32
  }
}

</mosaic_0001>

<bundles_post_ra>
// kernel: parse.1
= control target key start
LH: loop header
LB: loop body
LE: loop exit
PB: predicated region body
PF: predicated region fallthrough
CT: control target
= control target key end

     0   :  { %vm38_vm0 = vcmask 1040384   ;;  %vm105_vm1 = vcmask 1043456   ;;  %s330_s0 = inlined_call_operand.vmem [shape: f32[16,128], index: 0, kind: input, shape index: {}]   ;;  %s331_s1 = inlined_call_operand.vmem [shape: f32[1,128], index: 1, kind: input, shape index: {}]   ;;  %s332_s2 = inlined_call_operand.vmem [shape: f32[1,128], index: 2, kind: input, shape index: {}]   ;;  %s333_s3 = inlined_call_operand.vmem [shape: f32[128,128], index: 3, kind: input, shape index: {}]   ;;  %s334_s4 = inlined_call_operand.vmem [shape: f32[12,128], index: 4, kind: input, shape index: {}]   ;;  %s335_s5 = inlined_call_operand.vmem [shape: f32[1,2], index: 5, kind: input, shape index: {}]   ;;  %s336_s6 = inlined_call_operand.hbm [shape: f32[1,128], index: 6, kind: output, shape index: {}]  }
   0x1   :  { %v24_v0 = vld [vmem:[%s330_s0] sm:$0xff]  ;;  %v25_v1 = vld [vmem:[%s330_s0 + $0x8] sm:$0xff]  ;;  %v64_v9 = vld [vmem:[%s333_s3 + $0x10] sm:$0xff] }
   0x2   :  { %v50_v2 = vld [vmem:[%s332_s2] sm:$0x1]  ;;  %v26_v3 = vadd.f32 %v25_v1, %v24_v0  ;;  %v104_v6 = vld [vmem:[%s334_s4 + $0x8] sm:$0xf]  ;;  %v65_v14 = vld [vmem:[%s333_s3 + $0x18] sm:$0xff] }
   0x3   :  { %v51_v4 = vsel %vm38_vm0, %v50_v2, 0.0  ;;  %v37_v5 = vld [vmem:[%s331_s1] sm:$0x1]  ;;  %v63_v8 = vld [vmem:[%s333_s3 + $0x8] sm:$0xff]  ;;  %v106_v13 = vsel %vm105_vm1, %v104_v6, 0.0 }
   0x4   :  { %52 = vadd.xlane.f32.xlu1 %v51_v4  ;;  %v62_v7 = vld [vmem:[%s333_s3] sm:$0xff]  ;;  %27 = vadd.xlane.f32.xlu0 %v26_v3  ;;  %v39_v11 = vsel %vm38_vm0, %v37_v5, 0.0 }
   0x5   :  { %v78_v10 = vadd.f32 %v63_v8, %v62_v7  ;;  %v103_v12 = vld [vmem:[%s334_s4] sm:$0xff] }
   0x6   :  { %v66_v16 = vld [vmem:[%s333_s3 + $0x20] sm:$0xff]  ;;  %v107_v17 = vadd.f32 %v106_v13, %v103_v12 }
   0x7   :  { %v79_v15 = vadd.f32 %v78_v10, %v64_v9 }
   0x8   :  { %40 = vadd.xlane.f32.xlu0 %v39_v11 }
   0x9   :  { %v80_v18 = vadd.f32 %v79_v15, %v65_v14 }
   0xa   :  { %11 = vsyncpa [#allocation3], 0  ;;  %v67_v19 = vld [vmem:[%s333_s3 + $0x28] sm:$0xff]  ;;  %v68_v21 = vld [vmem:[%s333_s3 + $0x30] sm:$0xff]  ;;  %vm119_vm2 = vcmask 8192   ;;  %s213_s23 = smov [#allocation2]  }
   0xb   :  { %v81_v20 = vadd.f32 %v80_v18, %v66_v16  ;;  %v69_v23 = vld [vmem:[%s333_s3 + $0x38] sm:$0xff]  ;;  %v70_v25 = vld [vmem:[%s333_s3 + $0x40] sm:$0xff]  ;;  %v71_v27 = vld [vmem:[%s333_s3 + $0x48] sm:$0xff]  ;;  %s168_s24 = sshll.u32 %s213_s23, 4  ;;  %s169_s24 = int_to_ptr.vmem [resolvable:$true] %s168_s24 }
   0xc   :  { %108 = vadd.xlane.f32.xlu0 %v107_v17  ;;  %v72_v29 = vld [vmem:[%s333_s3 + $0x50] sm:$0xff]  ;;  %v73_v31 = vld [vmem:[%s333_s3 + $0x58] sm:$0xff]  ;;  %v74_v33 = vld [vmem:[%s333_s3 + $0x60] sm:$0xff]  ;;  %s189_s27 = scalar_lea.vmem %s169_s24, 16  ;;  %s193_s28 = scalar_lea.vmem %s169_s24, 32 }
   0xd   :  { %v82_v22 = vadd.f32 %v81_v20, %v67_v19  ;;  %v75_v35 = vld [vmem:[%s333_s3 + $0x68] sm:$0xff]  ;;  %v76_v37 = vld [vmem:[%s333_s3 + $0x70] sm:$0xff]  ;;  %v77_v39 = vld [vmem:[%s333_s3 + $0x78] sm:$0xff]  ;;  %p190_p0 = scmp.ne.s32.totalorder %s169_s24, %s189_s27  ;;  %p194_p1 = scmp.lt.s32.totalorder %s169_s24, %s169_s24 }
   0xe   :  { %v118_v42 = vld [vmem:[%s335_s5] sm:$0x1]  ;;  %p195_p2 = scmp.lt.s32.totalorder %s193_s28, %s189_s27 }
   0xf   :  { %v83_v24 = vadd.f32 %v82_v22, %v68_v21  ;;  %v120_v43 = vsel %vm119_vm2, %v118_v42, 0.0  ;;  %v141_v22 = vlaneseq }
  0x10   :  { %p196_p3 = por %p195_p2, %p194_p1 }
  0x11   :  { %v84_v26 = vadd.f32 %v83_v24, %v69_v23  ;;  %v142_v23 = vand.u32 127, %v141_v22 }
  0x12   :  { %p197_p4 = pnand %p196_p3, %p190_p0 }
  0x13   :  { %v85_v28 = vadd.f32 %v84_v26, %v70_v25  ;;  %vm143_vm3 = vcmp.eq.s32.totalorder %v142_v23, 0  ;;  %vm146_vm4 = vcmp.eq.s32.totalorder %v142_v23, 1  ;;  %vm149_vm5 = vcmp.eq.s32.totalorder %v142_v23, 2 }
  0x14   :  { %vm152_vm6 = vcmp.eq.s32.totalorder %v142_v23, 3  ;;  %vm155_vm7 = vcmp.eq.s32.totalorder %v142_v23, 4  ;;  %vm158_vm8 = vcmp.eq.s32.totalorder %v142_v23, 5 }
  0x15   :  { %v86_v30 = vadd.f32 %v85_v28, %v71_v27 }
  0x17   :  { %v87_v32 = vadd.f32 %v86_v30, %v72_v29 }
  0x19   :  { %v88_v34 = vadd.f32 %v87_v32, %v73_v31 }
  0x1b   :  { %v89_v36 = vadd.f32 %v88_v34, %v74_v33 }
  0x1d   :  { %v90_v38 = vadd.f32 %v89_v36, %v75_v35 }
  0x1f   :  { %v91_v40 = vadd.f32 %v90_v38, %v76_v37 }
  0x21   :  { %v92_v41 = vadd.f32 %v91_v40, %v77_v39 }
  0x23   :  { %93 = vadd.xlane.f32.xlu1 %v92_v41 }
  0x27   :  { %121 = vadd.xlane.f32.xlu1 %v120_v43 }
  0x91   :  { %v53_v44 = vpop.xlane.xlu1 %52  ;;  %v28_v45 = vpop.xlane.xlu0 %27 }
  0x92   :  { %v54_v46 = vrot.slane %v53_v44, 4  ;;  %v29_v47 = vrot.slane %v28_v45, 4 }
  0x94   :  { %v55_v48 = vadd.f32 %v54_v46, %v53_v44  ;;  %v30_v49 = vadd.f32 %v29_v47, %v28_v45 }
  0x95   :  { %v41_v51 = vpop.xlane.xlu0 %40 }
  0x96   :  { %v56_v50 = vrot.slane %v55_v48, 2  ;;  %v31_v52 = vrot.slane %v30_v49, 2  ;;  %v42_v53 = vrot.slane %v41_v51, 4 }
  0x98   :  { %v57_v54 = vadd.f32 %v56_v50, %v55_v48  ;;  %v43_v55 = vadd.f32 %v42_v53, %v41_v51  ;;  %v32_v56 = vadd.f32 %v31_v52, %v30_v49 }
  0x99   :  { %v109_v1 = vpop.xlane.xlu0 %108 }
  0x9a   :  { %v44_v57 = vrot.slane %v43_v55, 2  ;;  %v33_v58 = vrot.slane %v32_v56, 1  ;;  %v58_v59 = vrot.slane %v57_v54, 1  ;;  %v110_v2 = vrot.slane %v109_v1, 4 }
  0x9c   :  { %v34_v60 = vadd.f32 %v33_v58, %v32_v56  ;;  %v45_v61 = vadd.f32 %v44_v57, %v43_v55  ;;  %v59_v63 = vadd.f32 %v58_v59, %v57_v54  ;;  %v111_v3 = vadd.f32 %v110_v2, %v109_v1 }
  0x9e   :  { %176 = vpush %v34_v60  ;;  %v46_v62 = vrot.slane %v45_v61, 1  ;;  %v112_v4 = vrot.slane %v111_v3, 2 }
  0xa0   :  { %v47_v0 = vadd.f32 %v46_v62, %v45_v61  ;;  %v113_v8 = vadd.f32 %v112_v4, %v111_v3 }
  0xa2   :  { %178 = vpush %v47_v0  ;;  %v114_v14 = vrot.slane %v113_v8, 1 }
  0xa3   :  { %180 = vpush %v59_v63 }
  0xa4   :  { %v115_v19 = vadd.f32 %v114_v14, %v113_v8 }
  0xb0   :  { %v94_v5 = vpop.xlane.xlu1 %93 }
  0xb1   :  { %v95_v6 = vrot.slane %v94_v5, 4 }
  0xb3   :  { %v96_v7 = vadd.f32 %v95_v6, %v94_v5 }
  0xb4   :  { %v122_v9 = vpop.xlane.xlu1 %121 }
  0xb5   :  { %v97_v10 = vrot.slane %v96_v7, 2  ;;  %v123_v11 = vrot.slane %v122_v9, 4 }
  0xb7   :  { %v124_v12 = vadd.f32 %v123_v11, %v122_v9  ;;  %v98_v13 = vadd.f32 %v97_v10, %v96_v7 }
  0xb9   :  { %v125_v15 = vrot.slane %v124_v12, 2  ;;  %v99_v16 = vrot.slane %v98_v13, 1 }
  0xbb   :  { %v126_v17 = vadd.f32 %v125_v15, %v124_v12  ;;  %v100_v18 = vadd.f32 %v99_v16, %v98_v13 }
  0xbd   :  { %182 = vpush %v100_v18  ;;  %v127_v20 = vrot.slane %v126_v17, 1 }
  0xbe   :  { %184 = vpush %v115_v19 }
  0xbf   :  { %v128_v21 = vadd.f32 %v127_v20, %v126_v17 }
  0xc1   :  { %186 = vpush %v128_v21 }
  0xcf   :  { %s177_s3 = spop %176 }
  0xd0   :  { %s36_s15 = smul.f32 0.00048828125, %s177_s3 }
  0xd2   :  { %v144_v24 = vstv %s36_s15 }
  0xd3   :  { %s179_s5 = spop %178  ;;  %v145_v25 = vsel %vm143_vm3, %v144_v24, 0.0 }
  0xd4   :  { %s181_s12 = spop %180  ;;  %s49_s13 = smul.f32 0.0078125, %s179_s5 }
  0xd5   :  { %s61_s14 = smul.f32 0.0078125, %s181_s12 }
  0xd7   :  { %s133_s16 = sadd.f32 %s61_s14, %s49_s13 }
  0xd9   :  { %v147_v26 = vstv %s133_s16  ;;  %s138_s4 = sadd.f32 %s133_s16, %s36_s15 }
  0xda   :  { %v148_v27 = vsel %vm146_vm4, %v147_v26, %v145_v25 }
  0xee   :  { %s183_s17 = spop %182 }
  0xef   :  { %s102_s18 = smul.f32 6.1035156e-05, %s183_s17  ;;  %s185_s19 = spop %184 }
  0xf0   :  { %s117_s20 = smul.f32 0.00066666666, %s185_s19 }
  0xf1   :  { %s139_s21 = sadd.f32 %s138_s4, %s102_s18  ;;  %v150_v28 = vstv %s102_s18 }
  0xf2   :  { %v151_v29 = vsel %vm149_vm5, %v150_v28, %v148_v27  ;;  %v153_v30 = vstv %s117_s20  ;;  %s187_s22 = spop %186 }
  0xf3   :  { %s140_s25 = sadd.f32 %s139_s21, %s117_s20  ;;  %s130_s26 = smul.f32 0.5, %s187_s22  ;;  %v154_v32 = vsel %vm152_vm6, %v153_v30, %v151_v29 }
  0xf5   :  { %v159_v31 = vstv %s140_s25  ;;  %v156_v33 = vstv %s130_s26 }
  0xf6   :  { %v157_v34 = vsel %vm155_vm7, %v156_v33, %v154_v32 }
  0xf7   :  { %v160_v35 = vsel %vm158_vm8, %v159_v31, %v157_v34 }
  0xf8   :  { %161 = vst [vmem:[#allocation2] sm:$0x1] %v160_v35 }
  0xf9   :  { %200 = shalt.err (!%p197_p4)
}
  0xfa   :  { %s201_s7 = scalar_lea.hbm %s336_s6, 16 }
  0xfb   :  { %p202_p5 = scmp.ne.s32.totalorder %s336_s6, %s201_s7  ;;  %p205_p6 = scmp.lt.u32.totalorder %s201_s7, %s336_s6 }
  0xfd   :  { %p207_p7 = pnand %p205_p6, %p202_p5 }
  0xff   :  { %210 = shalt.err (!%p207_p7)
}
 0x100   :  { %171 = dma.vmem_to_hbm [thread:$0]  %s169_s24, 16, %s336_s6, [#allocation3]  }
 0x101   :  { %211 = dma.done.wait [#allocation3], 16  }
 0x102   :  { %212 = vsyncadd [#allocation3], 4294967280 }
 0x103   :  { %175 = vsyncpa [#allocation3], 1 }

</bundles_post_ra>
